<compile_context>
chip_gen: v7x
topology: tpu7x:2x2x1
jax: 0.10.0
libtpu: 0.0.40
codegen_flags: <defaults>
</compile_context>

<pallas_src>
import numpy as np
import jax
import jax.numpy as jnp
from jax.experimental import pallas as pl
from jax.experimental.pallas import tpu as pltpu


# ----------------------------------------------------------------------------
# Small in-kernel helpers.
# ----------------------------------------------------------------------------

def _bf(v):
    return v.astype(jnp.bfloat16)


def _mm(a, b):
    # bf16 x bf16 MXU matmul with f32 accumulation.
    return jnp.dot(a, b, preferred_element_type=jnp.float32)


# ----------------------------------------------------------------------------
# Fused Pallas kernels (whole arrays resident in VMEM; shapes here are tiny).
# ----------------------------------------------------------------------------

def _frontend_pool1_kernel(x_ref, a_ref, w1_ref, b1_ref, w2_ref, b2_ref,
                           p1_ref, xp1_ref):
    """conv1 -> relu -> conv2 (split-weight concat) -> relu -> pool1 (mean)."""
    hid = w1_ref.shape[1]
    x_in = x_ref[...]                       # [Np, 128] f32, zero-padded features
    xb = _bf(x_in)
    a = a_ref[...]                          # [Np, Np] bf16 normalized adjacency
    # GCNConv1 + relu (dropout == identity in eval)
    h1 = jnp.maximum(_mm(a, _bf(_mm(xb, w1_ref[...]))) + b1_ref[...], 0.0)
    # GCNConv2 on cat(conv1_out, x_in): split-weight sum, no concat materialized
    t2 = _mm(_bf(h1), w2_ref[:hid, :]) + _mm(xb, w2_ref[hid:, :])
    h2 = jnp.maximum(_mm(a, _bf(t2)) + b2_ref[...], 0.0)
    # pool1: static fixed-size clusters, mean pooling (P1 rows hold 1/|cluster|)
    p1 = p1_ref[...]
    xp1_ref[...] = jnp.concatenate([_mm(p1, xb), _mm(p1, _bf(h2))], axis=-1)


def _mid_chain_kernel(xp1_ref, a1_ref, w3_ref, b3_ref, wf1_ref, bf1_ref,
                      p2_ref, a2_ref, w4_ref, b4_ref, wf2_ref, bf2_ref,
                      p3_ref, a3_ref, w5_ref, b5_ref, wf3_ref, bf3_ref,
                      out_ref):
    """conv3/fc1/pool2/conv4/fc2/pool3/conv5/fc3, fully fused in one call."""
    hid = w4_ref.shape[0]
    cin = w3_ref.shape[0]                   # pool1 feature width (hid + fpad)
    x1 = _bf(xp1_ref[...])                  # [N1p, cin]
    a1 = a1_ref[...]
    # conv3 + relu
    h3 = jnp.maximum(_mm(a1, _bf(_mm(x1, w3_ref[...]))) + b3_ref[...], 0.0)
    # fc1 on cat(pool1_x, conv3) + relu (split-weight)
    g1 = jnp.maximum(_mm(x1, wf1_ref[:cin, :]) + _mm(_bf(h3), wf1_ref[cin:, :])
                     + bf1_ref[...], 0.0)
    # pool2
    x2 = _mm(p2_ref[...], _bf(g1))          # [N2p, hid]
    # conv4 + relu
    h4 = jnp.maximum(_mm(a2_ref[...], _bf(_mm(_bf(x2), w4_ref[...]))) + b4_ref[...], 0.0)
    # fc2 on cat(pool2_x, conv4) + relu
    g2 = jnp.maximum(_mm(_bf(x2), wf2_ref[:hid, :]) + _mm(_bf(h4), wf2_ref[hid:, :])
                     + bf2_ref[...], 0.0)
    # pool3
    x3 = _mm(p3_ref[...], _bf(g2))          # [N3p, hid]
    # conv5 + relu
    h5 = jnp.maximum(_mm(a3_ref[...], _bf(_mm(_bf(x3), w5_ref[...]))) + b5_ref[...], 0.0)
    # fc3 on cat(pool3_x, conv5) + relu
    out_ref[...] = jnp.maximum(_mm(_bf(x3), wf3_ref[:hid, :])
                               + _mm(_bf(h5), wf3_ref[hid:, :])
                               + bf3_ref[...], 0.0)


def _unpool_head_kernel(g1_ref, xp1_ref, xin_ref, wf4_ref, bf4_ref,
                        wf5_ref, bf5_ref, out_ref):
    """unpool cascade (collapses to gather of pool1's output) -> fc4 -> fc5 -> sigmoid."""
    fpad = xin_ref.shape[1]
    # pool3.unpool / pool2.unpool / pool1.unpool each overwrite x in the reference;
    # the cascade reduces to gathering pool1's stored output back to the fine nodes.
    u = _mm(g1_ref[...], _bf(xp1_ref[...]))                 # [Np, fpad + hid]
    # fc4 + relu
    h6 = jnp.maximum(_mm(_bf(u), wf4_ref[...]) + bf4_ref[...], 0.0)
    # fc5 on cat(x_in, fc4_out) with a single output unit: VPU multiply + lane
    # reduce (keeps the MXU out of a [N,1] matmul; only the final tiny output is
    # a 1-wide store).
    w5 = wf5_ref[...]                                        # [1, fpad + hid] f32
    logits = (jnp.sum(xin_ref[...] * w5[:, :fpad], axis=-1, keepdims=True)
              + jnp.sum(h6 * w5[:, fpad:], axis=-1, keepdims=True)
              + bf5_ref[...])
    out_ref[...] = pl.reciprocal(1.0 + jnp.exp(-logits), approx=True)   # sigmoid


def _whole_array_call(kernel, out_shape, *args):
    # Every operand is tiny (< a few hundred KiB total), so whole-array VMEM
    # residency with a single launch and no HBM round-trips between layers is
    # optimal on v5e/v6e/v7x alike.
    return pl.pallas_call(
        kernel,
        out_shape=out_shape,
        in_specs=[pl.BlockSpec(memory_space=pltpu.MemorySpace.VMEM) for _ in args],
        out_specs=pl.BlockSpec(memory_space=pltpu.MemorySpace.VMEM),
    )(*args)


# ----------------------------------------------------------------------------
# Host-side static graph / pooling structure (depends only on the edge list).
# ----------------------------------------------------------------------------

def _round_up(v, m):
    return ((v + m - 1) // m) * m


def gcn_norm_dense(edge_index, num_nodes):
    """Dense D^-1/2 (A + I) D^-1/2 (gcn_norm with unit weights, self-loops)."""
    src = edge_index[0].astype(np.int64)
    dst = edge_index[1].astype(np.int64)
    mask = src != dst
    loops = np.arange(num_nodes, dtype=np.int64)
    src = np.concatenate([src[mask], loops])
    dst = np.concatenate([dst[mask], loops])
    w = np.ones(src.shape[0], dtype=np.float32)
    deg = np.zeros(num_nodes, dtype=np.float32)
    np.add.at(deg, dst, w)
    with np.errstate(divide="ignore"):
        dinv = deg ** -0.5
    dinv[np.isinf(dinv)] = 0.0
    norm = dinv[src] * w * dinv[dst]
    a = np.zeros((num_nodes, num_nodes), dtype=np.float32)
    np.add.at(a, (dst, src), norm)
    return a


def _pool_level(n_real, cluster_size, edge_index, n_cols):
    """Fixed-size-cluster mean pooling: P [n_out_pad, n_cols], coarsened edges."""
    cluster = np.arange(n_real, dtype=np.int64) // cluster_size
    n_out = int(cluster.max()) + 1
    n_out_pad = _round_up(n_out, 8)
    counts = np.bincount(cluster, minlength=n_out).astype(np.float32)
    p = np.zeros((n_out_pad, n_cols), dtype=np.float32)
    p[cluster, np.arange(n_real)] = 1.0 / counts[cluster]
    new_edge_index = np.unique(cluster[edge_index], axis=1)
    return cluster, n_out, n_out_pad, p, new_edge_index


# ----------------------------------------------------------------------------
# Parameter init (synthetic, padded to 128-lane feature dims) and the forward.
# ----------------------------------------------------------------------------

def init_params(key, node_features, fpad=128, hid=128):
    """Weights at padded shapes (feature dim F zero-padded to `fpad`); the rows
    multiplying the zero-padding contribute nothing, so this is equivalent to an
    unpadded model. Matmul weights stored in bf16, biases/f c5 row in f32."""
    del node_features  # features are zero-padded to `fpad`
    w_shapes = {
        "w1": (fpad, hid),             # conv1
        "w2": (hid + fpad, hid),       # conv2 on [conv1 | x_in]
        "w3": (hid + fpad, hid),       # conv3 on pooled [x_in | conv2]
        "wf1": (2 * hid + fpad, hid),  # fc1 on [pool1_x | conv3]
        "w4": (hid, hid),              # conv4
        "wf2": (2 * hid, hid),         # fc2 on [pool2_x | conv4]
        "w5": (hid, hid),              # conv5
        "wf3": (2 * hid, hid),         # fc3 on [pool3_x | conv5]
        "wf4": (hid + fpad, hid),      # fc4 on unpooled pool1 features
    }
    params = {}
    keys = jax.random.split(key, len(w_shapes) + 1)
    for k_, (name, shp) in zip(keys[:-1], sorted(w_shapes.items())):
        kw, kb = jax.random.split(k_)
        scale = 1.0 / np.sqrt(shp[0])
        params[name] = (jax.random.normal(kw, shp, jnp.float32) * scale).astype(jnp.bfloat16)
        params["b" + name[1:]] = jax.random.normal(kb, (1, shp[1]), jnp.float32) * 0.01
    kw, kb = jax.random.split(keys[-1])
    params["wf5"] = jax.random.normal(kw, (1, fpad + hid), jnp.float32) / np.sqrt(fpad + hid)
    params["bf5"] = jax.random.normal(kb, (1, 1), jnp.float32) * 0.01
    return params


def graph_conv_dag_pool_forward(data, params, cluster_sizes=(5, 3, 3)):
    x_raw, edge_list = data
    edge_index = np.ascontiguousarray(np.asarray(edge_list).T)   # == data[1].t()
    n, f = int(x_raw.shape[0]), int(x_raw.shape[1])
    fpad, hid = params["w1"].shape
    n_pad = _round_up(n, 8)

    # Static graph / pooling structure (host numpy; depends only on the edge list
    # and cluster sizes, so the device forward has zero host sync points).
    a0 = gcn_norm_dense(edge_index, n_pad)
    c1, n1, n1p, p1, ei1 = _pool_level(n, cluster_sizes[0], edge_index, n_pad)
    a1 = gcn_norm_dense(ei1, n1p)
    c2, n2, n2p, p2, ei2 = _pool_level(n1, cluster_sizes[1], ei1, n1p)
    a2 = gcn_norm_dense(ei2, n2p)
    c3, n3, n3p, p3, ei3 = _pool_level(n2, cluster_sizes[2], ei2, n2p)
    a3 = gcn_norm_dense(ei3, n3p)
    g1m = np.zeros((n_pad, n1p), dtype=np.float32)
    g1m[np.arange(n), c1] = 1.0                    # unpool gather: cluster -> node

    bf = jnp.bfloat16
    a0_b, a1_b, a2_b, a3_b = (jnp.asarray(m, bf) for m in (a0, a1, a2, a3))
    p1_b, p2_b, p3_b = (jnp.asarray(m, bf) for m in (p1, p2, p3))
    g1_b = jnp.asarray(g1m, bf)

    # Pad node features once, up front, to a lane-dense 128-wide layout (x_in).
    x_in = jnp.zeros((n_pad, fpad), jnp.float32).at[:n, :f].set(
        x_raw.astype(jnp.float32))

    # Kernel 1: conv1 -> relu -> conv2 -> relu -> pool1 (all fused).
    xp1 = _whole_array_call(
        _frontend_pool1_kernel,
        jax.ShapeDtypeStruct((n1p, hid + fpad), jnp.float32),
        x_in, a0_b, params["w1"], params["b1"], params["w2"], params["b2"], p1_b)

    # Kernel 2: conv3/fc1/pool2/conv4/fc2/pool3/conv5/fc3 chain, fused into one
    # call. The reference computes this and then discards it (x is overwritten by
    # pool3/pool2/pool1.unpool); kept for parity at the cost of a single launch.
    _ = _whole_array_call(
        _mid_chain_kernel,
        jax.ShapeDtypeStruct((n3p, hid), jnp.float32),
        xp1, a1_b, params["w3"], params["b3"], params["wf1"], params["bf1"],
        p2_b, a2_b, params["w4"], params["b4"], params["wf2"], params["bf2"],
        p3_b, a3_b, params["w5"], params["b5"], params["wf3"], params["bf3"])

    # Kernel 3: unpool (gather) -> fc4 -> relu -> fc5 -> sigmoid (fused head).
    probs = _whole_array_call(
        _unpool_head_kernel,
        jax.ShapeDtypeStruct((n_pad, 1), jnp.float32),
        g1_b, xp1, x_in, params["wf4"], params["bf4"], params["wf5"], params["bf5"])

    return probs[:n, 0]                            # torch.flatten(torch.sigmoid(x))


if __name__ == "__main__":
    key = jax.random.PRNGKey(0)
    N, F_FEAT, HID = 16, 8, 128        # num_classes == 2 -> single sigmoid output

    # Small undirected graph: ring + 2-hop chords, both directions, [E, 2].
    edges = []
    for i in range(N):
        for j in (i + 1, i + 2):
            edges.append((i, j % N))
            edges.append((j % N, i))
    edge_list = np.array(edges, dtype=np.int64)    # (64, 2)

    k_x, k_p = jax.random.split(key)
    x = jax.random.normal(k_x, (N, F_FEAT), dtype=jnp.float32)
    params = init_params(k_p, node_features=F_FEAT, fpad=128, hid=HID)

    out = graph_conv_dag_pool_forward((x, edge_list), params, cluster_sizes=(5, 3, 3))
    out = jax.block_until_ready(out)
    assert out.shape == (N,)
    assert bool(np.all(np.isfinite(np.asarray(out))))
    print("KERNEL_OK")
</pallas_src>

<mosaic_0001>
module attributes {stable_mosaic.version = 11 : i64} {
  func.func @_frontend_pool1_kernel(%arg0: memref<16x128xf32, #tpu.memory_space<vmem>>, %arg1: memref<16x16xbf16, #tpu.memory_space<vmem>>, %arg2: memref<128x128xbf16, #tpu.memory_space<vmem>>, %arg3: memref<1x128xf32, #tpu.memory_space<vmem>>, %arg4: memref<256x128xbf16, #tpu.memory_space<vmem>>, %arg5: memref<1x128xf32, #tpu.memory_space<vmem>>, %arg6: memref<8x16xbf16, #tpu.memory_space<vmem>>, %arg7: memref<8x256xf32, #tpu.memory_space<vmem>>) attributes {dimension_semantics = [], scalar_prefetch = 0 : i64, scratch_operands = 0 : i64, tpu.core_type = #tpu.core_type<tc>} {
    %c0 = arith.constant 0 : index
    %c0_0 = arith.constant 0 : index
    %0 = vector.load %arg0[%c0, %c0_0] : memref<16x128xf32, #tpu.memory_space<vmem>>, vector<16x128xf32>
    %1 = arith.truncf %0 : vector<16x128xf32> to vector<16x128xbf16>
    %c0_1 = arith.constant 0 : index
    %c0_2 = arith.constant 0 : index
    %2 = vector.load %arg1[%c0_1, %c0_2] : memref<16x16xbf16, #tpu.memory_space<vmem>>, vector<16x16xbf16>
    %c0_3 = arith.constant 0 : index
    %c0_4 = arith.constant 0 : index
    %3 = vector.load %arg2[%c0_3, %c0_4] : memref<128x128xbf16, #tpu.memory_space<vmem>>, vector<128x128xbf16>
    %cst = arith.constant dense<0.000000e+00> : vector<16x128xf32>
    %4 = tpu.matmul %1, %3, %cst {dimension_numbers = #tpu.dot_dimension_numbers<[1], [0], [0], [1], [0, 0, 1, 1], [], []>} : vector<16x128xbf16>, vector<128x128xbf16>, vector<16x128xf32> -> vector<16x128xf32>
    %5 = arith.truncf %4 : vector<16x128xf32> to vector<16x128xbf16>
    %cst_5 = arith.constant dense<0.000000e+00> : vector<16x128xf32>
    %6 = tpu.matmul %2, %5, %cst_5 {dimension_numbers = #tpu.dot_dimension_numbers<[1], [0], [0], [1], [0, 0, 1, 1], [], []>} : vector<16x16xbf16>, vector<16x128xbf16>, vector<16x128xf32> -> vector<16x128xf32>
    %c0_6 = arith.constant 0 : index
    %c0_7 = arith.constant 0 : index
    %7 = vector.load %arg3[%c0_6, %c0_7] : memref<1x128xf32, #tpu.memory_space<vmem>>, vector<1x128xf32>
    %8 = vector.broadcast %7 : vector<1x128xf32> to vector<16x128xf32>
    %9 = arith.addf %6, %8 : vector<16x128xf32>
    %cst_8 = arith.constant 0.000000e+00 : f32
    %10 = vector.broadcast %cst_8 : f32 to vector<16x128xf32>
    %11 = arith.maximumf %9, %10 : vector<16x128xf32>
    %12 = arith.truncf %11 : vector<16x128xf32> to vector<16x128xbf16>
    %c0_9 = arith.constant 0 : index
    %c0_10 = arith.constant 0 : index
    %13 = vector.load %arg4[%c0_9, %c0_10] : memref<256x128xbf16, #tpu.memory_space<vmem>>, vector<128x128xbf16>
    %cst_11 = arith.constant dense<0.000000e+00> : vector<16x128xf32>
    %14 = tpu.matmul %12, %13, %cst_11 {dimension_numbers = #tpu.dot_dimension_numbers<[1], [0], [0], [1], [0, 0, 1, 1], [], []>} : vector<16x128xbf16>, vector<128x128xbf16>, vector<16x128xf32> -> vector<16x128xf32>
    %c128 = arith.constant 128 : index
    %c0_12 = arith.constant 0 : index
    %15 = vector.load %arg4[%c128, %c0_12] : memref<256x128xbf16, #tpu.memory_space<vmem>>, vector<128x128xbf16>
    %cst_13 = arith.constant dense<0.000000e+00> : vector<16x128xf32>
    %16 = tpu.matmul %1, %15, %cst_13 {dimension_numbers = #tpu.dot_dimension_numbers<[1], [0], [0], [1], [0, 0, 1, 1], [], []>} : vector<16x128xbf16>, vector<128x128xbf16>, vector<16x128xf32> -> vector<16x128xf32>
    %17 = arith.addf %14, %16 : vector<16x128xf32>
    %18 = arith.truncf %17 : vector<16x128xf32> to vector<16x128xbf16>
    %cst_14 = arith.constant dense<0.000000e+00> : vector<16x128xf32>
    %19 = tpu.matmul %2, %18, %cst_14 {dimension_numbers = #tpu.dot_dimension_numbers<[1], [0], [0], [1], [0, 0, 1, 1], [], []>} : vector<16x16xbf16>, vector<16x128xbf16>, vector<16x128xf32> -> vector<16x128xf32>
    %c0_15 = arith.constant 0 : index
    %c0_16 = arith.constant 0 : index
    %20 = vector.load %arg5[%c0_15, %c0_16] : memref<1x128xf32, #tpu.memory_space<vmem>>, vector<1x128xf32>
    %21 = vector.broadcast %20 : vector<1x128xf32> to vector<16x128xf32>
    %22 = arith.addf %19, %21 : vector<16x128xf32>
    %cst_17 = arith.constant 0.000000e+00 : f32
    %23 = vector.broadcast %cst_17 : f32 to vector<16x128xf32>
    %24 = arith.maximumf %22, %23 : vector<16x128xf32>
    %c0_18 = arith.constant 0 : index
    %c0_19 = arith.constant 0 : index
    %25 = vector.load %arg6[%c0_18, %c0_19] : memref<8x16xbf16, #tpu.memory_space<vmem>>, vector<8x16xbf16>
    %cst_20 = arith.constant dense<0.000000e+00> : vector<8x128xf32>
    %26 = tpu.matmul %25, %1, %cst_20 {dimension_numbers = #tpu.dot_dimension_numbers<[1], [0], [0], [1], [0, 0, 1, 1], [], []>} : vector<8x16xbf16>, vector<16x128xbf16>, vector<8x128xf32> -> vector<8x128xf32>
    %27 = arith.truncf %24 : vector<16x128xf32> to vector<16x128xbf16>
    %cst_21 = arith.constant dense<0.000000e+00> : vector<8x128xf32>
    %28 = tpu.matmul %25, %27, %cst_21 {dimension_numbers = #tpu.dot_dimension_numbers<[1], [0], [0], [1], [0, 0, 1, 1], [], []>} : vector<8x16xbf16>, vector<16x128xbf16>, vector<8x128xf32> -> vector<8x128xf32>
    %29 = tpu.concatenate %26, %28 in 1 : vector<8x128xf32>, vector<8x128xf32> -> vector<8x256xf32>
    %c0_22 = arith.constant 0 : index
    %c0_23 = arith.constant 0 : index
    %30 = vector.load %arg7[%c0_22, %c0_23] : memref<8x256xf32, #tpu.memory_space<vmem>>, vector<8x256xf32>
    tpu.vector_store %arg7[%c0_22, %c0_23], %29 {strides = array<i32>} : memref<8x256xf32, #tpu.memory_space<vmem>>, vector<8x256xf32>,
    return
  }
}

</mosaic_0001>

<bundles_post_ra>
// kernel: tpu_custom_call.1
= control target key start
LH: loop header
LB: loop body
LE: loop exit
PB: predicated region body
PF: predicated region fallthrough
CT: control target
= control target key end

     0   :  { %12 = vsyncpa [#allocation3], 0  ;;  %s1114_s0 = inlined_call_operand.hbm [shape: f32[16,128], index: 0, kind: input, shape index: {}]   ;;  %s1115_s1 = inlined_call_operand.hbm [shape: bf16[16,16], index: 1, kind: input, shape index: {}]   ;;  %s1116_s2 = inlined_call_operand.hbm [shape: bf16[128,128], index: 2, kind: input, shape index: {}]   ;;  %s1117_s3 = inlined_call_operand.vmem [shape: f32[1,128], index: 3, kind: input, shape index: {}]   ;;  %s1118_s4 = inlined_call_operand.hbm [shape: bf16[256,128], index: 4, kind: input, shape index: {}]   ;;  %s1119_s5 = inlined_call_operand.vmem [shape: f32[1,128], index: 5, kind: input, shape index: {}]   ;;  %s1120_s6 = inlined_call_operand.vmem [shape: bf16[8,16], index: 6, kind: input, shape index: {}]   ;;  %s1121_s7 = inlined_call_operand.hbm [shape: f32[8,256], index: 7, kind: output, shape index: {}]  }
   0x1   :  { %13 = vsyncpa [#allocation6], 0 }
   0x2   :  { %14 = vsyncpa [#allocation9], 0 }
   0x3   :  { %15 = vsyncpa [#allocation4], 0  ;;  %s927_s24 = smov [#allocation5]   ;;  %s809_s28 = scalar_lea.hbm %s1115_s1, 128 }
   0x4   :  { %s33_s25 = sshll.u32 %s927_s24, 4  ;;  %p810_p0 = scmp.ne.s32.totalorder %s1115_s1, %s809_s28  ;;  %s34_s25 = int_to_ptr.vmem [resolvable:$true] %s33_s25 }
   0x5   :  { %p813_p1 = scmp.lt.u32.totalorder %s809_s28, %s1115_s1 }
   0x7   :  { %p815_p2 = pnand %p813_p1, %p810_p0 }
   0x9   :  { %818 = shalt.err (!%p815_p2)
}
   0xa   :  { %s819_s10 = scalar_lea.vmem %s34_s25, 128  ;;  %p824_p4 = scmp.lt.s32.totalorder %s34_s25, %s34_s25 }
   0xb   :  { %p820_p3 = scmp.ne.s32.totalorder %s34_s25, %s819_s10  ;;  %p825_p5 = scmp.lt.s32.totalorder %s819_s10, %s819_s10 }
   0xd   :  { %p826_p6 = por %p825_p5, %p824_p4 }
   0xf   :  { %p827_p7 = pnand %p826_p6, %p820_p3 }
  0x11   :  { %830 = shalt.err (!%p827_p7)
}
  0x12   :  { %s928_s11 = smov 64   ;;  %s929_s12 = smov 4  }
  0x13   :  { %39 = dma.hbm_to_vmem [thread:$0]  %s1115_s1, 128, %s34_s25, [#allocation6], %s928_s11, %s928_s11, %s929_s12  }
  0x14   :  { %s930_s15 = smov [#allocation2]   ;;  %s831_s19 = scalar_lea.hbm %s1114_s0, 256 }
  0x15   :  { %s21_s16 = sshll.u32 %s930_s15, 4  ;;  %p832_p8 = scmp.ne.s32.totalorder %s1114_s0, %s831_s19  ;;  %s22_s16 = int_to_ptr.vmem [resolvable:$true] %s21_s16 }
  0x16   :  { %p835_p9 = scmp.lt.u32.totalorder %s831_s19, %s1114_s0 }
  0x18   :  { %p837_p10 = pnand %p835_p9, %p832_p8 }
  0x1a   :  { %840 = shalt.err (!%p837_p10)
}
  0x1b   :  { %s841_s24 = scalar_lea.vmem %s22_s16, 256  ;;  %p846_p12 = scmp.lt.s32.totalorder %s22_s16, %s22_s16 }
  0x1c   :  { %p842_p11 = scmp.ne.s32.totalorder %s22_s16, %s841_s24  ;;  %p847_p13 = scmp.lt.s32.totalorder %s841_s24, %s841_s24 }
  0x1e   :  { %p848_p0 = por %p847_p13, %p846_p12 }
  0x20   :  { %p849_p1 = pnand %p848_p0, %p842_p11 }
  0x22   :  { %852 = shalt.err (!%p849_p1)
}
  0x23   :  { %s931_s1 = smov 128   ;;  %s932_s25 = smov 8  }
  0x24   :  { %27 = dma.hbm_to_vmem [thread:$0]  %s1114_s0, 256, %s22_s16, [#allocation3], %s931_s1, %s931_s1, %s932_s25  }
  0x25   :  { %s933_s28 = smov [#allocation7]   ;;  %s934_s30 = smov [#allocation8]  }
  0x26   :  { %s45_s29 = sshll.u32 %s933_s28, 4  ;;  %s59_s8 = sshll.u32 %s934_s30, 4  ;;  %s46_s29 = int_to_ptr.vmem [resolvable:$true] %s45_s29  ;;  %s1005_s8 = int_to_ptr.vmem [resolvable:$true] %s59_s8 }
  0x27   :  { %s853_s13 = scalar_lea.hbm %s1116_s2, 1024 }
  0x28   :  { %p854_p2 = scmp.ne.s32.totalorder %s1116_s2, %s853_s13  ;;  %p857_p3 = scmp.lt.u32.totalorder %s853_s13, %s1116_s2 }
  0x2a   :  { %p859_p4 = pnand %p857_p3, %p854_p2 }
  0x2c   :  { %862 = shalt.err (!%p859_p4)
}
  0x2d   :  { %s863_s0 = scalar_lea.vmem %s46_s29, 1024  ;;  %p868_p6 = scmp.lt.s32.totalorder %s46_s29, %s46_s29 }
  0x2e   :  { %p864_p5 = scmp.ne.s32.totalorder %s46_s29, %s863_s0  ;;  %p869_p7 = scmp.lt.s32.totalorder %s863_s0, %s863_s0 }
  0x30   :  { %p870_p8 = por %p869_p7, %p868_p6 }
  0x32   :  { %p871_p9 = pnand %p870_p8, %p864_p5 }
  0x34   :  { %874 = shalt.err (!%p871_p9)
}
  0x35   :  { %51 = dma.hbm_to_vmem [thread:$0]  %s1116_s2, 1024, %s46_s29, [#allocation6], %s928_s11, %s928_s11, %s929_s12  }
  0x36   :  { %s875_s22 = scalar_lea.hbm %s1118_s4, 2048 }
  0x37   :  { %p876_p10 = scmp.ne.s32.totalorder %s1118_s4, %s875_s22  ;;  %p879_p11 = scmp.lt.u32.totalorder %s875_s22, %s1118_s4 }
  0x39   :  { %p881_p12 = pnand %p879_p11, %p876_p10 }
  0x3b   :  { %884 = shalt.err (!%p881_p12)
}
  0x3c   :  { %s885_s26 = scalar_lea.vmem %s1005_s8, 2048  ;;  %p890_p0 = scmp.lt.s32.totalorder %s1005_s8, %s1005_s8 }
  0x3d   :  { %p886_p13 = scmp.ne.s32.totalorder %s1005_s8, %s885_s26  ;;  %p891_p1 = scmp.lt.s32.totalorder %s885_s26, %s885_s26 }
  0x3f   :  { %p892_p2 = por %p891_p1, %p890_p0 }
  0x41   :  { %p893_p3 = pnand %p892_p2, %p886_p13 }
  0x43   :  { %896 = shalt.err (!%p893_p3)
}
  0x44   :  { %65 = dma.hbm_to_vmem [thread:$0]  %s1118_s4, 2048, %s1005_s8, [#allocation9], %s928_s11, %s928_s11, %s929_s12  }
  0x45   :  { %919 = dma.done.wait [#allocation3], 256  }
  0x46   :  { %920 = vsyncadd [#allocation3], 4294967040 }
  0x47   :  { %921 = dma.done.wait [#allocation6], 1152  }
  0x48   :  { %922 = vsyncadd [#allocation6], 4294966144 }
  0x49   :  { %923 = dma.done.wait [#allocation9], 2048  }
  0x4a   :  { %924 = vsyncadd [#allocation9], 4294965248  ;;  %v935_v0 = vmov 0.0   ;;  %vm936_vm0 = vmmov 0   ;;  %v784_v1 = vld [vmem:[#allocation7] sm:$0xff]   ;;  %v785_v2 = vld [vmem:[#allocation7 + $0x8] sm:$0xff]  }
  0x4b   :  { %685 = vmatprep.subr.bf16.mxu0 %v935_v0  ;;  %701 = vmatprep.mubr.msk.bf16.mxu0 %vm936_vm0, %v935_v0  ;;  %v786_v3 = vld [vmem:[#allocation7 + $0x10] sm:$0xff]   ;;  %v787_v4 = vld [vmem:[#allocation7 + $0x18] sm:$0xff]   ;;  %v788_v5 = vld [vmem:[#allocation7 + $0x20] sm:$0xff]   ;;  %vm206_vm1 = vcmask 130048  }
  0x4c   :  { %711 = vmatprep.subr.bf16.mxu1 %v935_v0  ;;  %727 = vmatprep.mubr.msk.bf16.mxu1 %vm936_vm0, %v935_v0  ;;  %v789_v6 = vld [vmem:[#allocation7 + $0x28] sm:$0xff]   ;;  %v790_v7 = vld [vmem:[#allocation7 + $0x30] sm:$0xff]   ;;  %v791_v8 = vld [vmem:[#allocation7 + $0x38] sm:$0xff]  }
  0x4d   :  { %686 = vmatpush3.bf16.msra.mxu0 %v784_v1  ;;  %v83_v9 = vld [vmem:[#allocation2] sm:$0xff]  ;;  %v84_v10 = vld [vmem:[#allocation2 + $0x8] sm:$0xff]  ;;  %v793_v12 = vld [vmem:[#allocation8 + $0x40] sm:$0xff]  }
  0x4e   :  { %687 = vmatprep.subr.bf16.mxu0 %v935_v0  ;;  %v1055_v11 = vpack.c.bf16 %v84_v10, %v83_v9  ;;  %712 = vmatpush3.bf16.msra.mxu1 %v793_v12  ;;  %v794_v13 = vld [vmem:[#allocation8 + $0x48] sm:$0xff]   ;;  %v795_v14 = vld [vmem:[#allocation8 + $0x50] sm:$0xff]   ;;  %v796_v15 = vld [vmem:[#allocation8 + $0x58] sm:$0xff]  }
  0x4f   :  { %713 = vmatprep.subr.bf16.mxu1 %v935_v0  ;;  %v797_v16 = vld [vmem:[#allocation8 + $0x60] sm:$0xff]   ;;  %v798_v17 = vld [vmem:[#allocation8 + $0x68] sm:$0xff]   ;;  %v799_v18 = vld [vmem:[#allocation8 + $0x70] sm:$0xff]  }
  0x50   :  { %v800_v19 = vld [vmem:[#allocation8 + $0x78] sm:$0xff]   ;;  %v801_v20 = vld [vmem:[#allocation8] sm:$0xff]   ;;  %v802_v21 = vld [vmem:[#allocation8 + $0x8] sm:$0xff]  }
  0x51   :  { %688 = vmatpush3.bf16.msra.mxu0 %v785_v2  ;;  %v803_v22 = vld [vmem:[#allocation8 + $0x10] sm:$0xff]   ;;  %v804_v23 = vld [vmem:[#allocation8 + $0x18] sm:$0xff]   ;;  %v805_v24 = vld [vmem:[#allocation8 + $0x20] sm:$0xff]  }
  0x52   :  { %689 = vmatprep.subr.bf16.mxu0 %v935_v0  ;;  %714 = vmatpush3.bf16.msra.mxu1 %v794_v13  ;;  %v806_v25 = vld [vmem:[#allocation8 + $0x28] sm:$0xff]   ;;  %v792_v31 = vld [vmem:[#allocation5] sm:$0xff]   ;;  %v807_v32 = vld [vmem:[#allocation8 + $0x30] sm:$0xff]  }
  0x53   :  { %715 = vmatprep.subr.bf16.mxu1 %v935_v0  ;;  %v808_v33 = vld [vmem:[#allocation8 + $0x38] sm:$0xff]   ;;  %v627_v34 = vld [vmem:[%s1117_s3] ss:$0 sm:$0xff] }
  0x54   :  { %v515_v49 = vld [vmem:[%s1120_s6] sm:$0xf]  ;;  %s937_s6 = smov [#allocation10]  }
  0x55   :  { %690 = vmatpush3.bf16.msra.mxu0 %v786_v3  ;;  %v646_v50 = vld [vmem:[%s1119_s5] ss:$0 sm:$0xff]  ;;  %s608_s30 = sshll.u32 %s937_s6, 4  ;;  %s609_s30 = int_to_ptr.vmem [resolvable:$true] %s608_s30 }
  0x56   :  { %691 = vmatprep.subr.bf16.mxu0 %v935_v0  ;;  %716 = vmatpush3.bf16.msra.mxu1 %v795_v14  ;;  %s897_s5 = scalar_lea.vmem %s609_s30, 256  ;;  %p902_p5 = scmp.lt.s32.totalorder %s609_s30, %s609_s30 }
  0x57   :  { %717 = vmatprep.subr.bf16.mxu1 %v935_v0  ;;  %p898_p4 = scmp.ne.s32.totalorder %s609_s30, %s897_s5  ;;  %p903_p6 = scmp.lt.s32.totalorder %s897_s5, %s897_s5 }
  0x59   :  { %692 = vmatpush3.bf16.msra.mxu0 %v787_v4  ;;  %p904_p7 = por %p903_p6, %p902_p5 }
  0x5a   :  { %693 = vmatprep.subr.bf16.mxu0 %v935_v0  ;;  %718 = vmatpush3.bf16.msra.mxu1 %v796_v15 }
  0x5b   :  { %719 = vmatprep.subr.bf16.mxu1 %v935_v0  ;;  %p905_p8 = pnand %p904_p7, %p898_p4 }
  0x5d   :  { %694 = vmatpush3.bf16.msra.mxu0 %v788_v5 }
  0x5e   :  { %695 = vmatprep.subr.bf16.mxu0 %v935_v0  ;;  %720 = vmatpush3.bf16.msra.mxu1 %v797_v16 }
  0x5f   :  { %721 = vmatprep.subr.bf16.mxu1 %v935_v0 }
  0x61   :  { %696 = vmatpush3.bf16.msra.mxu0 %v789_v6 }
  0x62   :  { %697 = vmatprep.subr.bf16.mxu0 %v935_v0  ;;  %722 = vmatpush3.bf16.msra.mxu1 %v798_v17 }
  0x63   :  { %723 = vmatprep.subr.bf16.mxu1 %v935_v0 }
  0x65   :  { %698 = vmatpush3.bf16.msra.mxu0 %v790_v7 }
  0x66   :  { %699 = vmatprep.subr.bf16.mxu0 %v935_v0  ;;  %724 = vmatpush3.bf16.msra.mxu1 %v799_v18 }
  0x67   :  { %725 = vmatprep.subr.bf16.mxu1 %v935_v0 }
  0x69   :  { %700 = vmatpush3.bf16.msra.mxu0 %v791_v8 }
  0x6a   :  { %705 = vmatprep.subr.bf16.mxu0 %v935_v0  ;;  %726 = vmatpush3.bf16.msra.mxu1 %v800_v19 }
  0x6b   :  { %731 = vmatprep.subr.bf16.mxu1 %v935_v0 }
  0x6c   :  { %702 = vmatmul.mubr.bf16.vlgmr.msra.gmra.mrb[0].mxu0 %v1055_v11 }
  0x6d   :  { %707 = vmatprep.mubr.msk.bf16.mxu0 %vm936_vm0, %v935_v0  ;;  %728 = vmatmul.mubr.bf16.vlgmr.msra.gmra.mrb[0].mxu1 %v1055_v11 }
  0x6e   :  { %732 = vmatpush3.bf16.msra.mxu1 %v801_v20  ;;  %747 = vmatprep.mubr.msk.bf16.mxu1 %vm936_vm0, %v935_v0 }
  0x6f   :  { %733 = vmatprep.subr.bf16.mxu1 %v935_v0 }
  0x72   :  { %734 = vmatpush3.bf16.msra.mxu1 %v802_v21 }
  0x73   :  { %735 = vmatprep.subr.bf16.mxu1 %v935_v0 }
  0x76   :  { %736 = vmatpush3.bf16.msra.mxu1 %v803_v22 }
  0x77   :  { %737 = vmatprep.subr.bf16.mxu1 %v935_v0 }
  0x7a   :  { %738 = vmatpush3.bf16.msra.mxu1 %v804_v23 }
  0x7b   :  { %739 = vmatprep.subr.bf16.mxu1 %v935_v0 }
  0x7e   :  { %740 = vmatpush3.bf16.msra.mxu1 %v805_v24 }
  0x7f   :  { %741 = vmatprep.subr.bf16.mxu1 %v935_v0 }
  0x82   :  { %742 = vmatpush3.bf16.msra.mxu1 %v806_v25 }
  0x83   :  { %743 = vmatprep.subr.bf16.mxu1 %v935_v0 }
  0x86   :  { %744 = vmatpush3.bf16.msra.mxu1 %v807_v32 }
  0x87   :  { %745 = vmatprep.subr.bf16.mxu1 %v935_v0 }
  0x8a   :  { %746 = vmatpush3.bf16.msra.mxu1 %v808_v33 }
 0x13f   :  { %v186_v26 = vpop.f32.mrb[0].mxu0 }
 0x140   :  { %v703_v27 = vpop.f32.mrb[1].mxu0 }
 0x141   :  { %v189_v28 = vpop.f32.mrb[2].mxu0 }
 0x142   :  { %v193_v29 = vpack.c.bf16 %v189_v28, %v186_v26  ;;  %v704_v30 = vpop.f32.mrb[3].mxu0 }
 0x144   :  { %706 = vmatpush3.bf16.msra.mxu0 %v193_v29 }
 0x145   :  { %751 = vmatprep.subr.bf16.mxu0 %v935_v0 }
 0x147   :  { %708 = vmatmul.mubr.msk.bf16.vlgmr.msra.gmra.mrb[4].mxu0 %vm206_vm1, %v792_v31 }
 0x148   :  { %753 = vmatprep.mubr.msk.bf16.mxu0 %vm936_vm0, %v935_v0 }
 0x21a   :  { %v244_v35 = vpop.f32.mrb[4].mxu0 }
 0x21b   :  { %v245_v36 = vadd.f32 %v627_v34, %v244_v35  ;;  %v709_v37 = vpop.f32.mrb[5].mxu0 }
 0x21c   :  { %v247_v38 = vpop.f32.mrb[6].mxu0 }
 0x21d   :  { %v248_v39 = vadd.f32 %v627_v34, %v247_v38  ;;  %v710_v40 = vpop.f32.mrb[7].mxu0  ;;  %v251_v41 = vmax.f32 %v245_v36, 0.0 }
 0x21f   :  { %v252_v42 = vmax.f32 %v248_v39, 0.0 }
 0x221   :  { %v253_v43 = vpack.c.bf16 %v252_v42, %v251_v41 }
 0x223   :  { %748 = vmatmul.mubr.bf16.vlgmr.msra.gmra.mrb[0].mxu1 %v253_v43 }
 0x2f6   :  { %v457_v44 = vpop.f32.mrb[0].mxu1 }
 0x2f7   :  { %v749_v45 = vpop.f32.mrb[1].mxu1 }
 0x2f8   :  { %v460_v46 = vpop.f32.mrb[2].mxu1 }
 0x2f9   :  { %v464_v47 = vpack.c.bf16 %v460_v46, %v457_v44  ;;  %v750_v48 = vpop.f32.mrb[3].mxu1 }
 0x2fb   :  { %752 = vmatpush3.bf16.msra.mxu0 %v464_v47 }
 0x2fc   :  { %757 = vmatprep.subr.bf16.mxu0 %v935_v0 }
 0x2fe   :  { %754 = vmatmul.mubr.msk.bf16.vlgmr.msra.gmra.mrb[8].mxu0 %vm206_vm1, %v792_v31 }
 0x2ff   :  { %758 = vmatpush3.bf16.msra.mxu0 %v1055_v11  ;;  %759 = vmatprep.mubr.msk.bf16.mxu0 %vm936_vm0, %v935_v0 }
 0x300   :  { %763 = vmatprep.subr.bf16.mxu0 %v935_v0 }
 0x306   :  { %760 = vmatmul.mubr.msk.bf16.vlgmr.msra.gmra.mrb[12].mxu0 %vm206_vm1, %v515_v49 }
 0x307   :  { %765 = vmatprep.mubr.msk.bf16.mxu0 %vm936_vm0, %v935_v0 }
 0x3d1   :  { %v506_v51 = vpop.f32.mrb[8].mxu0 }
 0x3d2   :  { %v507_v52 = vadd.f32 %v646_v50, %v506_v51  ;;  %v755_v53 = vpop.f32.mrb[9].mxu0 }
 0x3d3   :  { %v509_v54 = vpop.f32.mrb[10].mxu0 }
 0x3d4   :  { %v510_v55 = vadd.f32 %v646_v50, %v509_v54  ;;  %v756_v56 = vpop.f32.mrb[11].mxu0  ;;  %v513_v57 = vmax.f32 %v507_v52, 0.0 }
 0x3d6   :  { %v514_v58 = vmax.f32 %v510_v55, 0.0 }
 0x3d8   :  { %v559_v59 = vpack.c.bf16 %v514_v58, %v513_v57 }
 0x3d9   :  { %v553_v60 = vpop.f32.mrb[12].mxu0 }
 0x3da   :  { %764 = vmatpush3.bf16.msra.mxu0 %v559_v59  ;;  %600 = vst [vmem:[#allocation10] sm:$0xff] %v553_v60  ;;  %v761_v61 = vpop.f32.mrb[13].mxu0 }
 0x3db   :  { %v556_v62 = vpop.f32.mrb[14].mxu0 }
 0x3dc   :  { %v762_v63 = vpop.f32.mrb[15].mxu0 }
 0x3dd   :  { %766 = vmatmul.mubr.msk.bf16.vlgmr.msra.gmra.mrb[16].mxu0 %vm206_vm1, %v515_v49 }
 0x4b0   :  { %v594_v0 = vpop.f32.mrb[16].mxu0 }
 0x4b1   :  { %601 = vst [vmem:[#allocation10 + $0x8] sm:$0xff] %v594_v0  ;;  %v767_v1 = vpop.f32.mrb[17].mxu0 }
 0x4b2   :  { %v597_v2 = vpop.f32.mrb[18].mxu0 }
 0x4b3   :  { %908 = shalt.err (!%p905_p8)
}
 0x4b4   :  { %s909_s10 = scalar_lea.hbm %s1121_s7, 256 }
 0x4b5   :  { %p910_p9 = scmp.ne.s32.totalorder %s1121_s7, %s909_s10  ;;  %p913_p10 = scmp.lt.u32.totalorder %s909_s10, %s1121_s7 }
 0x4b7   :  { %p915_p11 = pnand %p913_p10, %p910_p9 }
 0x4b9   :  { %918 = shalt.err (!%p915_p11)
}
 0x4ba   :  { %611 = dma.vmem_to_hbm [thread:$0]  %s609_s30, 256, %s1121_s7, [#allocation4]   ;;  %v768_v3 = vpop.f32.mrb[19].mxu0 }
 0x4bb   :  { %925 = dma.done.wait [#allocation4], 256  }
 0x4bc   :  { %926 = vsyncadd [#allocation4], 4294967040 }
 0x4bd   :  { %615 = vsyncpa [#allocation3], 1 }
 0x4be   :  { %616 = vsyncpa [#allocation6], 1 }
 0x4bf   :  { %617 = vsyncpa [#allocation9], 1 }
 0x4c0   :  { %618 = vsyncpa [#allocation4], 1 }

</bundles_post_ra>
